<compile_context>
chip_gen: v7x
topology: tpu7x:2x2x1
jax: 0.10.0
libtpu: 0.0.40
codegen_flags: <defaults>
</compile_context>

<pallas_src>
import jax
import jax.numpy as jnp
from jax import lax
from jax.experimental import pallas as pl
from jax.experimental.pallas import tpu as pltpu


def _round_up(x: int, m: int) -> int:
    return ((x + m - 1) // m) * m


def _mlp_embed_kernel(
    # inputs (VMEM blocks)
    tok_ref,      # (TB, S)        int32   tokens for this batch tile
    emb_ref,      # (TV, E_pad)    f32     vocab tile of the embedding table
    w1_ref,       # (E_pad, H_pad) f32     resident
    b1_ref,       # (1, H_pad)     f32
    w2_ref,       # (H_pad, O_pad) f32
    b2_ref,       # (1, O_pad)     f32
    # outputs
    out_ref,      # (TB, O_pad)    f32
    # scratch
    pooled_ref,   # (TB, E_pad)    f32     seq-sum accumulator over vocab tiles
):
    TB, S = tok_ref.shape
    TV = emb_ref.shape[0]
    v = pl.program_id(1)

    @pl.when(v == 0)
    def _init():
        pooled_ref[...] = jnp.zeros_like(pooled_ref)

    # Build the token-counts matrix for this vocab tile:
    #   counts[b, j] = #{ s : tok[b, s] == v*TV + j }
    # S is a small compile-time constant -> static unrolled VPU compares.
    tok = tok_ref[...]                                               # (TB, S)
    vocab_ids = lax.broadcasted_iota(jnp.int32, (TB, TV), 1) + v * TV
    counts = jnp.zeros((TB, TV), jnp.float32)
    for s in range(S):
        counts += (vocab_ids == tok[:, s:s + 1]).astype(jnp.float32)

    # Embedding gather + seq-sum as one MXU matmul (accumulated over vocab tiles).
    pooled_ref[...] += jnp.dot(counts, emb_ref[...],
                               preferred_element_type=jnp.float32)

    @pl.when(v == pl.num_programs(1) - 1)
    def _epilogue():
        pooled = pooled_ref[...] * (1.0 / float(S))                  # == x.mean(dim=1)
        h = jnp.dot(pooled, w1_ref[...],
                    preferred_element_type=jnp.float32) + b1_ref[...]
        h = jnp.maximum(h, 0.0)                                      # ReLU
        o = jnp.dot(h, w2_ref[...],
                    preferred_element_type=jnp.float32) + b2_ref[...]
        out_ref[...] = o.astype(out_ref.dtype)                       # lane-dense store


def simple_mlp_with_embedding(tokens, emb_table, w1, b1, w2, b2, *,
                              batch_tile=256):
    """tokens: [B, S] int; returns logits [B, O] f32.

    Out-of-range token ids contribute zero (no OOB access is possible with the
    counts-matrix gather)."""
    B, S = tokens.shape
    V, E = emb_table.shape
    H = w1.shape[1]
    O = w2.shape[1]

    # --- tile / padding choices -------------------------------------------
    TB = _round_up(min(batch_tile, _round_up(B, 8)), 8)   # batch tile (sublane aligned)
    B_pad = _round_up(B, TB)
    E_pad = _round_up(E, 128)                              # lane-dense matmul K dim
    H_pad = _round_up(H, 128)                              # lane-dense hidden
    O_pad = _round_up(O, 128)                              # lane-dense output store

    # Vocab tile: lane-dense (multiple of 128), capped so the double-buffered
    # table tile stays well inside the v7x 64 MiB VMEM (and v5e/v6e budgets).
    bytes_per_row = E_pad * 4
    cap_rows = max(128, ((8 * 1024 * 1024) // bytes_per_row) // 128 * 128)
    TV = min(_round_up(max(V, 1), 128), 2048, cap_rows)
    V_pad = _round_up(V, TV)

    # --- zero-padded operands ---------------------------------------------
    tokens_p = jnp.zeros((B_pad, S), jnp.int32).at[:B, :].set(tokens.astype(jnp.int32))
    emb_p = jnp.zeros((V_pad, E_pad), jnp.float32).at[:V, :E].set(emb_table.astype(jnp.float32))
    w1_p = jnp.zeros((E_pad, H_pad), jnp.float32).at[:E, :H].set(w1.astype(jnp.float32))
    b1_p = jnp.zeros((1, H_pad), jnp.float32).at[0, :H].set(b1.astype(jnp.float32))
    w2_p = jnp.zeros((H_pad, O_pad), jnp.float32).at[:H, :O].set(w2.astype(jnp.float32))
    b2_p = jnp.zeros((1, O_pad), jnp.float32).at[0, :O].set(b2.astype(jnp.float32))

    grid = (B_pad // TB, V_pad // TV)   # (batch tiles, vocab tiles) — vocab is the reduction axis

    grid_spec = pltpu.PrefetchScalarGridSpec(
        num_scalar_prefetch=0,
        grid=grid,
        in_specs=[
            pl.BlockSpec((TB, S), lambda i, v: (i, 0)),           # tokens (VMEM block)
            pl.BlockSpec((TV, E_pad), lambda i, v: (v, 0)),       # table tile (resident if 1 tile)
            pl.BlockSpec((E_pad, H_pad), lambda i, v: (0, 0)),    # W1 resident
            pl.BlockSpec((1, H_pad), lambda i, v: (0, 0)),        # b1
            pl.BlockSpec((H_pad, O_pad), lambda i, v: (0, 0)),    # W2
            pl.BlockSpec((1, O_pad), lambda i, v: (0, 0)),        # b2
        ],
        out_specs=pl.BlockSpec((TB, O_pad), lambda i, v: (i, 0)),
        scratch_shapes=[pltpu.VMEM((TB, E_pad), jnp.float32)],    # pooled accumulator
    )

    out_p = pl.pallas_call(
        _mlp_embed_kernel,
        out_shape=jax.ShapeDtypeStruct((B_pad, O_pad), jnp.float32),
        grid_spec=grid_spec,
        compiler_params=pltpu.CompilerParams(
            dimension_semantics=("parallel", "arbitrary"),
            vmem_limit_bytes=40 * 1024 * 1024,   # within scoped VMEM on v5e/v6e and under v7x's 64 MiB
        ),
    )(tokens_p, emb_p, w1_p, b1_p, w2_p, b2_p)

    return out_p[:B, :O]


def _reference(tokens, emb_table, w1, b1, w2, b2):
    emb = jnp.take(emb_table, tokens, axis=0)
    pooled = jnp.mean(emb, axis=1)
    h = jnp.maximum(pooled @ w1 + b1, 0.0)
    return h @ w2 + b2


if __name__ == "__main__":
    # Small, deterministic setup matching the torch module defaults.
    B, S = 2, 8            # batch, sequence length
    V, E = 32, 16          # vocab size, embedding dim
    H, O = 32, 8           # hidden dim (default [32]), output dim

    key = jax.random.PRNGKey(0)
    k_tok, k_emb, k_w1, k_b1, k_w2, k_b2 = jax.random.split(key, 6)

    tokens = jax.random.randint(k_tok, (B, S), 0, V, dtype=jnp.int32)

    emb_table = jax.random.normal(k_emb, (V, E), dtype=jnp.float32)          # nn.Embedding weight
    w1 = jax.random.normal(k_w1, (E, H), dtype=jnp.float32) * (1.0 / E ** 0.5)
    b1 = jax.random.normal(k_b1, (H,), dtype=jnp.float32) * 0.01
    w2 = jax.random.normal(k_w2, (H, O), dtype=jnp.float32) * (1.0 / H ** 0.5)
    b2 = jax.random.normal(k_b2, (O,), dtype=jnp.float32) * 0.01

    out = simple_mlp_with_embedding(tokens, emb_table, w1, b1, w2, b2)
    out = jax.block_until_ready(out)

    ref = _reference(tokens, emb_table, w1, b1, w2, b2)
    assert out.shape == (B, O)
    assert jnp.allclose(out, ref, atol=1e-4, rtol=1e-4), "kernel mismatch vs reference"

    print("KERNEL_OK")
</pallas_src>

<mosaic_0001>
module attributes {stable_mosaic.version = 11 : i64} {
  func.func @_mlp_embed_kernel(%arg0: i32, %arg1: i32, %arg2: memref<8x8xi32, #tpu.memory_space<vmem>>, %arg3: memref<128x128xf32, #tpu.memory_space<vmem>>, %arg4: memref<128x128xf32, #tpu.memory_space<vmem>>, %arg5: memref<1x128xf32, #tpu.memory_space<vmem>>, %arg6: memref<128x128xf32, #tpu.memory_space<vmem>>, %arg7: memref<1x128xf32, #tpu.memory_space<vmem>>, %arg8: memref<8x128xf32, #tpu.memory_space<vmem>>, %arg9: memref<8x128xf32, #tpu.memory_space<vmem>>) attributes {dimension_semantics = [#tpu.dimension_semantics<parallel>, #tpu.dimension_semantics<arbitrary>], iteration_bounds = array<i64: 1, 1>, scalar_prefetch = 0 : i64, scratch_operands = 1 : i64, tpu.core_type = #tpu.core_type<tc>, window_params = [{transform_indices = @transform_0, window_bounds = array<i64: 8, 8>}, {transform_indices = @transform_1, window_bounds = array<i64: 128, 128>}, {pipeline_mode = #tpu.pipeline_mode<synchronous>, transform_indices = @transform_2, window_bounds = array<i64: 128, 128>}, {pipeline_mode = #tpu.pipeline_mode<synchronous>, transform_indices = @transform_3, window_bounds = array<i64: 1, 128>}, {pipeline_mode = #tpu.pipeline_mode<synchronous>, transform_indices = @transform_4, window_bounds = array<i64: 128, 128>}, {pipeline_mode = #tpu.pipeline_mode<synchronous>, transform_indices = @transform_5, window_bounds = array<i64: 1, 128>}, {transform_indices = @transform_6, window_bounds = array<i64: 8, 128>}]} {
    %c0_i32 = arith.constant 0 : i32
    %0 = arith.cmpi eq, %arg1, %c0_i32 : i32
    %1 = arith.extui %0 : i1 to i32
    %c0_i32_0 = arith.constant 0 : i32
    %2 = arith.cmpi ne, %1, %c0_i32_0 : i32
    scf.if %2 {
      %cst_11 = arith.constant 0.000000e+00 : f32
      %65 = vector.broadcast %cst_11 : f32 to vector<8x128xf32>
      %c0_12 = arith.constant 0 : index
      %c0_13 = arith.constant 0 : index
      %66 = vector.load %arg9[%c0_12, %c0_13] : memref<8x128xf32, #tpu.memory_space<vmem>>, vector<8x128xf32>
      tpu.vector_store %arg9[%c0_12, %c0_13], %65 {strides = array<i32>} : memref<8x128xf32, #tpu.memory_space<vmem>>, vector<8x128xf32>,
    } else {
    }
    %c0 = arith.constant 0 : index
    %c0_1 = arith.constant 0 : index
    %3 = vector.load %arg2[%c0, %c0_1] : memref<8x8xi32, #tpu.memory_space<vmem>>, vector<8x8xi32>
    %4 = tpu.iota {dimensions = array<i32: 1>} : vector<8x128xi32>
    %c128_i32 = arith.constant 128 : i32
    %5 = arith.muli %arg1, %c128_i32 : i32
    %6 = vector.broadcast %5 : i32 to vector<8x128xi32>
    %7 = arith.addi %4, %6 : vector<8x128xi32>
    %cst = arith.constant 0.000000e+00 : f32
    %8 = vector.broadcast %cst : f32 to vector<8x128xf32>
    %9 = vector.extract_strided_slice %3 {offsets = [0, 0], sizes = [8, 1], strides = [1, 1]} : vector<8x8xi32> to vector<8x1xi32>
    %10 = vector.broadcast %9 : vector<8x1xi32> to vector<8x128xi32>
    %11 = arith.cmpi eq, %7, %10 : vector<8x128xi32>
    %12 = arith.extui %11 : vector<8x128xi1> to vector<8x128xi32>
    %13 = arith.sitofp %12 : vector<8x128xi32> to vector<8x128xf32>
    %14 = arith.addf %8, %13 : vector<8x128xf32>
    %15 = vector.extract_strided_slice %3 {offsets = [0, 1], sizes = [8, 1], strides = [1, 1]} : vector<8x8xi32> to vector<8x1xi32>
    %16 = vector.broadcast %15 : vector<8x1xi32> to vector<8x128xi32>
    %17 = arith.cmpi eq, %7, %16 : vector<8x128xi32>
    %18 = arith.extui %17 : vector<8x128xi1> to vector<8x128xi32>
    %19 = arith.sitofp %18 : vector<8x128xi32> to vector<8x128xf32>
    %20 = arith.addf %14, %19 : vector<8x128xf32>
    %21 = vector.extract_strided_slice %3 {offsets = [0, 2], sizes = [8, 1], strides = [1, 1]} : vector<8x8xi32> to vector<8x1xi32>
    %22 = vector.broadcast %21 : vector<8x1xi32> to vector<8x128xi32>
    %23 = arith.cmpi eq, %7, %22 : vector<8x128xi32>
    %24 = arith.extui %23 : vector<8x128xi1> to vector<8x128xi32>
    %25 = arith.sitofp %24 : vector<8x128xi32> to vector<8x128xf32>
    %26 = arith.addf %20, %25 : vector<8x128xf32>
    %27 = vector.extract_strided_slice %3 {offsets = [0, 3], sizes = [8, 1], strides = [1, 1]} : vector<8x8xi32> to vector<8x1xi32>
    %28 = vector.broadcast %27 : vector<8x1xi32> to vector<8x128xi32>
    %29 = arith.cmpi eq, %7, %28 : vector<8x128xi32>
    %30 = arith.extui %29 : vector<8x128xi1> to vector<8x128xi32>
    %31 = arith.sitofp %30 : vector<8x128xi32> to vector<8x128xf32>
    %32 = arith.addf %26, %31 : vector<8x128xf32>
    %33 = vector.extract_strided_slice %3 {offsets = [0, 4], sizes = [8, 1], strides = [1, 1]} : vector<8x8xi32> to vector<8x1xi32>
    %34 = vector.broadcast %33 : vector<8x1xi32> to vector<8x128xi32>
    %35 = arith.cmpi eq, %7, %34 : vector<8x128xi32>
    %36 = arith.extui %35 : vector<8x128xi1> to vector<8x128xi32>
    %37 = arith.sitofp %36 : vector<8x128xi32> to vector<8x128xf32>
    %38 = arith.addf %32, %37 : vector<8x128xf32>
    %39 = vector.extract_strided_slice %3 {offsets = [0, 5], sizes = [8, 1], strides = [1, 1]} : vector<8x8xi32> to vector<8x1xi32>
    %40 = vector.broadcast %39 : vector<8x1xi32> to vector<8x128xi32>
    %41 = arith.cmpi eq, %7, %40 : vector<8x128xi32>
    %42 = arith.extui %41 : vector<8x128xi1> to vector<8x128xi32>
    %43 = arith.sitofp %42 : vector<8x128xi32> to vector<8x128xf32>
    %44 = arith.addf %38, %43 : vector<8x128xf32>
    %45 = vector.extract_strided_slice %3 {offsets = [0, 6], sizes = [8, 1], strides = [1, 1]} : vector<8x8xi32> to vector<8x1xi32>
    %46 = vector.broadcast %45 : vector<8x1xi32> to vector<8x128xi32>
    %47 = arith.cmpi eq, %7, %46 : vector<8x128xi32>
    %48 = arith.extui %47 : vector<8x128xi1> to vector<8x128xi32>
    %49 = arith.sitofp %48 : vector<8x128xi32> to vector<8x128xf32>
    %50 = arith.addf %44, %49 : vector<8x128xf32>
    %51 = vector.extract_strided_slice %3 {offsets = [0, 7], sizes = [8, 1], strides = [1, 1]} : vector<8x8xi32> to vector<8x1xi32>
    %52 = vector.broadcast %51 : vector<8x1xi32> to vector<8x128xi32>
    %53 = arith.cmpi eq, %7, %52 : vector<8x128xi32>
    %54 = arith.extui %53 : vector<8x128xi1> to vector<8x128xi32>
    %55 = arith.sitofp %54 : vector<8x128xi32> to vector<8x128xf32>
    %56 = arith.addf %50, %55 : vector<8x128xf32>
    %c0_2 = arith.constant 0 : index
    %c0_3 = arith.constant 0 : index
    %57 = vector.load %arg9[%c0_2, %c0_3] : memref<8x128xf32, #tpu.memory_space<vmem>>, vector<8x128xf32>
    %c0_4 = arith.constant 0 : index
    %c0_5 = arith.constant 0 : index
    %58 = vector.load %arg3[%c0_4, %c0_5] : memref<128x128xf32, #tpu.memory_space<vmem>>, vector<128x128xf32>
    %cst_6 = arith.constant dense<0.000000e+00> : vector<8x128xf32>
    %59 = tpu.matmul %56, %58, %cst_6 {dimension_numbers = #tpu.dot_dimension_numbers<[1], [0], [0], [1], [0, 0, 1, 1], [], []>} : vector<8x128xf32>, vector<128x128xf32>, vector<8x128xf32> -> vector<8x128xf32>
    %60 = arith.addf %57, %59 : vector<8x128xf32>
    %c0_7 = arith.constant 0 : index
    %c0_8 = arith.constant 0 : index
    %61 = vector.load %arg9[%c0_7, %c0_8] : memref<8x128xf32, #tpu.memory_space<vmem>>, vector<8x128xf32>
    tpu.vector_store %arg9[%c0_7, %c0_8], %60 {strides = array<i32>} : memref<8x128xf32, #tpu.memory_space<vmem>>, vector<8x128xf32>,
    %c0_i32_9 = arith.constant 0 : i32
    %62 = arith.cmpi eq, %arg1, %c0_i32_9 : i32
    %63 = arith.extui %62 : i1 to i32
    %c0_i32_10 = arith.constant 0 : i32
    %64 = arith.cmpi ne, %63, %c0_i32_10 : i32
    scf.if %64 {
      %c0_11 = arith.constant 0 : index
      %c0_12 = arith.constant 0 : index
      %65 = vector.load %arg9[%c0_11, %c0_12] : memref<8x128xf32, #tpu.memory_space<vmem>>, vector<8x128xf32>
      %cst_13 = arith.constant 1.250000e-01 : f32
      %66 = vector.broadcast %cst_13 : f32 to vector<8x128xf32>
      %67 = arith.mulf %65, %66 : vector<8x128xf32>
      %c0_14 = arith.constant 0 : index
      %c0_15 = arith.constant 0 : index
      %68 = vector.load %arg4[%c0_14, %c0_15] : memref<128x128xf32, #tpu.memory_space<vmem>>, vector<128x128xf32>
      %cst_16 = arith.constant dense<0.000000e+00> : vector<8x128xf32>
      %69 = tpu.matmul %67, %68, %cst_16 {dimension_numbers = #tpu.dot_dimension_numbers<[1], [0], [0], [1], [0, 0, 1, 1], [], []>} : vector<8x128xf32>, vector<128x128xf32>, vector<8x128xf32> -> vector<8x128xf32>
      %c0_17 = arith.constant 0 : index
      %c0_18 = arith.constant 0 : index
      %70 = vector.load %arg5[%c0_17, %c0_18] : memref<1x128xf32, #tpu.memory_space<vmem>>, vector<1x128xf32>
      %71 = vector.broadcast %70 : vector<1x128xf32> to vector<8x128xf32>
      %72 = arith.addf %69, %71 : vector<8x128xf32>
      %cst_19 = arith.constant 0.000000e+00 : f32
      %73 = vector.broadcast %cst_19 : f32 to vector<8x128xf32>
      %74 = arith.maximumf %72, %73 : vector<8x128xf32>
      %c0_20 = arith.constant 0 : index
      %c0_21 = arith.constant 0 : index
      %75 = vector.load %arg6[%c0_20, %c0_21] : memref<128x128xf32, #tpu.memory_space<vmem>>, vector<128x128xf32>
      %cst_22 = arith.constant dense<0.000000e+00> : vector<8x128xf32>
      %76 = tpu.matmul %74, %75, %cst_22 {dimension_numbers = #tpu.dot_dimension_numbers<[1], [0], [0], [1], [0, 0, 1, 1], [], []>} : vector<8x128xf32>, vector<128x128xf32>, vector<8x128xf32> -> vector<8x128xf32>
      %c0_23 = arith.constant 0 : index
      %c0_24 = arith.constant 0 : index
      %77 = vector.load %arg7[%c0_23, %c0_24] : memref<1x128xf32, #tpu.memory_space<vmem>>, vector<1x128xf32>
      %78 = vector.broadcast %77 : vector<1x128xf32> to vector<8x128xf32>
      %79 = arith.addf %76, %78 : vector<8x128xf32>
      %c0_25 = arith.constant 0 : index
      %c0_26 = arith.constant 0 : index
      %80 = vector.load %arg8[%c0_25, %c0_26] : memref<8x128xf32, #tpu.memory_space<vmem>>, vector<8x128xf32>
      tpu.vector_store %arg8[%c0_25, %c0_26], %79 {strides = array<i32>} : memref<8x128xf32, #tpu.memory_space<vmem>>, vector<8x128xf32>,
    } else {
    }
    return
  }
  func.func @transform_0(%arg0: i32, %arg1: i32) -> (i32, i32) {
    %c0_i32 = arith.constant 0 : i32
    %c0_i32_0 = arith.constant 0 : i32
    return %arg0, %c0_i32 : i32, i32
  }
  func.func @transform_1(%arg0: i32, %arg1: i32) -> (i32, i32) {
    %c0_i32 = arith.constant 0 : i32
    %c0_i32_0 = arith.constant 0 : i32
    return %arg1, %c0_i32 : i32, i32
  }
  func.func @transform_2(%arg0: i32, %arg1: i32) -> (i32, i32) {
    %c0_i32 = arith.constant 0 : i32
    %c0_i32_0 = arith.constant 0 : i32
    %c0_i32_1 = arith.constant 0 : i32
    return %c0_i32, %c0_i32_0 : i32, i32
  }
  func.func @transform_3(%arg0: i32, %arg1: i32) -> (i32, i32) {
    %c0_i32 = arith.constant 0 : i32
    %c0_i32_0 = arith.constant 0 : i32
    %c0_i32_1 = arith.constant 0 : i32
    return %c0_i32, %c0_i32_0 : i32, i32
  }
  func.func @transform_4(%arg0: i32, %arg1: i32) -> (i32, i32) {
    %c0_i32 = arith.constant 0 : i32
    %c0_i32_0 = arith.constant 0 : i32
    %c0_i32_1 = arith.constant 0 : i32
    return %c0_i32, %c0_i32_0 : i32, i32
  }
  func.func @transform_5(%arg0: i32, %arg1: i32) -> (i32, i32) {
    %c0_i32 = arith.constant 0 : i32
    %c0_i32_0 = arith.constant 0 : i32
    %c0_i32_1 = arith.constant 0 : i32
    return %c0_i32, %c0_i32_0 : i32, i32
  }
  func.func @transform_6(%arg0: i32, %arg1: i32) -> (i32, i32) {
    %c0_i32 = arith.constant 0 : i32
    %c0_i32_0 = arith.constant 0 : i32
    return %arg0, %c0_i32 : i32, i32
  }
}

</mosaic_0001>

<bundles_post_ra>
// kernel: tpu_custom_call.1
= control target key start
LH: loop header
LB: loop body
LE: loop exit
PB: predicated region body
PF: predicated region fallthrough
CT: control target
= control target key end

     0   :  { %11 = vsyncpa [#allocation4], 0  ;;  %s992_s0 = inlined_call_operand.hbm [shape: s32[8,8], index: 0, kind: input, shape index: {}]   ;;  %s993_s1 = inlined_call_operand.hbm [shape: f32[128,128], index: 1, kind: input, shape index: {}]   ;;  %s994_s2 = inlined_call_operand.hbm [shape: f32[128,128], index: 2, kind: input, shape index: {}]   ;;  %s995_s3 = inlined_call_operand.vmem [shape: f32[1,128], index: 3, kind: input, shape index: {}]   ;;  %s996_s4 = inlined_call_operand.hbm [shape: f32[128,128], index: 4, kind: input, shape index: {}]   ;;  %s997_s5 = inlined_call_operand.vmem [shape: f32[1,128], index: 5, kind: input, shape index: {}]   ;;  %s998_s6 = inlined_call_operand.hbm [shape: f32[8,128], index: 6, kind: output, shape index: {}]  }
   0x1   :  { %12 = vsyncpa [#allocation7], 0 }
   0x2   :  { %13 = vsyncpa [#allocation10], 0 }
   0x3   :  { %14 = vsyncpa [#allocation5], 0  ;;  %s826_s21 = smov [#allocation6]   ;;  %s708_s25 = scalar_lea.hbm %s993_s1, 2048 }
   0x4   :  { %s30_s22 = sshll.u32 %s826_s21, 4  ;;  %p709_p0 = scmp.ne.s32.totalorder %s993_s1, %s708_s25  ;;  %s31_s22 = int_to_ptr.vmem [resolvable:$true] %s30_s22 }
   0x5   :  { %p712_p1 = scmp.lt.u32.totalorder %s708_s25, %s993_s1 }
   0x7   :  { %p714_p2 = pnand %p712_p1, %p709_p0 }
   0x9   :  { %717 = shalt.err (!%p714_p2)
}
   0xa   :  { %s718_s30 = scalar_lea.vmem %s31_s22, 2048  ;;  %p723_p4 = scmp.lt.s32.totalorder %s31_s22, %s31_s22 }
   0xb   :  { %p719_p3 = scmp.ne.s32.totalorder %s31_s22, %s718_s30  ;;  %p724_p5 = scmp.lt.s32.totalorder %s718_s30, %s718_s30 }
   0xd   :  { %p725_p6 = por %p724_p5, %p723_p4 }
   0xf   :  { %p726_p7 = pnand %p725_p6, %p719_p3 }
  0x11   :  { %729 = shalt.err (!%p726_p7)
}
  0x12   :  { %s827_s7 = smov 128   ;;  %s828_s8 = smov 8  }
  0x13   :  { %36 = dma.hbm_to_vmem [thread:$0]  %s993_s1, 2048, %s31_s22, [#allocation7], %s827_s7, %s827_s7, %s828_s8  }
  0x14   :  { %s829_s11 = smov [#allocation3]   ;;  %s830_s13 = smov [#allocation8]  }
  0x15   :  { %s21_s12 = sshll.u32 %s829_s11, 4  ;;  %s42_s14 = sshll.u32 %s830_s13, 4  ;;  %s22_s12 = int_to_ptr.vmem [resolvable:$true] %s21_s12  ;;  %s43_s14 = int_to_ptr.vmem [resolvable:$true] %s42_s14 }
  0x16   :  { %s730_s17 = scalar_lea.hbm %s992_s0, 128 }
  0x17   :  { %p731_p8 = scmp.ne.s32.totalorder %s992_s0, %s730_s17  ;;  %p734_p9 = scmp.lt.u32.totalorder %s730_s17, %s992_s0 }
  0x19   :  { %p736_p10 = pnand %p734_p9, %p731_p8 }
  0x1b   :  { %739 = shalt.err (!%p736_p10)
}
  0x1c   :  { %s740_s1 = scalar_lea.vmem %s22_s12, 128  ;;  %p745_p12 = scmp.lt.s32.totalorder %s22_s12, %s22_s12 }
  0x1d   :  { %p741_p11 = scmp.ne.s32.totalorder %s22_s12, %s740_s1  ;;  %p746_p13 = scmp.lt.s32.totalorder %s740_s1, %s740_s1 }
  0x1f   :  { %p747_p0 = por %p746_p13, %p745_p12 }
  0x21   :  { %p748_p1 = pnand %p747_p0, %p741_p11 }
  0x23   :  { %751 = shalt.err (!%p748_p1)
}
  0x24   :  { %24 = dma.hbm_to_vmem [thread:$0]  %s992_s0, 128, %s22_s12, [#allocation4]  }
  0x25   :  { %s752_s26 = scalar_lea.hbm %s994_s2, 2048 }
  0x26   :  { %p753_p2 = scmp.ne.s32.totalorder %s994_s2, %s752_s26  ;;  %p756_p3 = scmp.lt.u32.totalorder %s752_s26, %s994_s2 }
  0x28   :  { %p758_p4 = pnand %p756_p3, %p753_p2 }
  0x2a   :  { %761 = shalt.err (!%p758_p4)
}
  0x2b   :  { %s762_s9 = scalar_lea.vmem %s43_s14, 2048  ;;  %p767_p6 = scmp.lt.s32.totalorder %s43_s14, %s43_s14 }
  0x2c   :  { %p763_p5 = scmp.ne.s32.totalorder %s43_s14, %s762_s9  ;;  %p768_p7 = scmp.lt.s32.totalorder %s762_s9, %s762_s9 }
  0x2e   :  { %p769_p8 = por %p768_p7, %p767_p6 }
  0x30   :  { %p770_p9 = pnand %p769_p8, %p763_p5 }
  0x32   :  { %773 = shalt.err (!%p770_p9)
}
  0x33   :  { %48 = dma.hbm_to_vmem [thread:$0]  %s994_s2, 2048, %s43_s14, [#allocation7], %s827_s7, %s827_s7, %s828_s8  }
  0x34   :  { %s831_s11 = smov [#allocation9]   ;;  %s774_s16 = scalar_lea.hbm %s996_s4, 2048 }
  0x35   :  { %s56_s12 = sshll.u32 %s831_s11, 4  ;;  %p775_p10 = scmp.ne.s32.totalorder %s996_s4, %s774_s16  ;;  %s57_s12 = int_to_ptr.vmem [resolvable:$true] %s56_s12 }
  0x36   :  { %p778_p11 = scmp.lt.u32.totalorder %s774_s16, %s996_s4 }
  0x38   :  { %p780_p12 = pnand %p778_p11, %p775_p10 }
  0x3a   :  { %783 = shalt.err (!%p780_p12)
}
  0x3b   :  { %s784_s21 = scalar_lea.vmem %s57_s12, 2048  ;;  %p789_p0 = scmp.lt.s32.totalorder %s57_s12, %s57_s12 }
  0x3c   :  { %p785_p13 = scmp.ne.s32.totalorder %s57_s12, %s784_s21  ;;  %p790_p1 = scmp.lt.s32.totalorder %s784_s21, %s784_s21 }
  0x3e   :  { %p791_p2 = por %p790_p1, %p789_p0 }
  0x40   :  { %p792_p3 = pnand %p791_p2, %p785_p13 }
  0x42   :  { %795 = shalt.err (!%p792_p3)
}
  0x43   :  { %62 = dma.hbm_to_vmem [thread:$0]  %s996_s4, 2048, %s57_s12, [#allocation10], %s827_s7, %s827_s7, %s828_s8  }
  0x44   :  { %818 = dma.done.wait [#allocation4], 128  }
  0x45   :  { %819 = vsyncadd [#allocation4], 4294967168 }
  0x46   :  { %820 = dma.done.wait [#allocation7], 4096  }
  0x47   :  { %821 = vsyncadd [#allocation7], 4294963200 }
  0x48   :  { %822 = dma.done.wait [#allocation10], 2048  }
  0x49   :  { %823 = vsyncadd [#allocation10], 4294965248  ;;  %v832_v0 = vmov 2   ;;  %v833_v1 = vmov 0   ;;  %v834_v2 = vmov 0.0|0.0   ;;  %v82_v3 = vld [vmem:[#allocation3] sm:$0xff]  ;;  %v83_v56 = vlaneseq }
  0x4a   :  { %701 = vset.pattern.permute.xlu1 %v832_v0  ;;  %699 = vset.pattern.permute.xlu0 %v833_v1  ;;  %v145_v4 = vld [vmem:[#allocation6] sm:$0xff]  ;;  %v146_v5 = vld [vmem:[#allocation6 + $0x8] sm:$0xff]  ;;  %v147_v7 = vld [vmem:[#allocation6 + $0x10] sm:$0xff]  ;;  %v835_v10 = vmov 3   ;;  %v836_v11 = vmov 1   ;;  %v837_v17 = vmov 4  }
  0x4b   :  { %609 = vmatprep.subr.bf16.mxu0 %v834_v2  ;;  %633 = vmatprep.subr.bf16.mxu1 %v834_v2  ;;  %v610_v6 = vpack.c.bf16 %v146_v5, %v145_v4  ;;  %v148_v8 = vld [vmem:[#allocation6 + $0x18] sm:$0xff]  ;;  %v149_v12 = vld [vmem:[#allocation6 + $0x20] sm:$0xff]  ;;  %v150_v13 = vld [vmem:[#allocation6 + $0x28] sm:$0xff]  ;;  %v838_v18 = vmov 5   ;;  %v839_v22 = vmov 6   ;;  %v840_v23 = vmov 7  }
  0x4c   :  { %103 = vperm.xlu1 %701, %v82_v3   ;;  %89 = vperm.xlu0 %699, %v82_v3   ;;  %v613_v9 = vpack.c.bf16 %v148_v8, %v147_v7  ;;  %v616_v14 = vpack.c.bf16 %v150_v13, %v149_v12  ;;  %v151_v15 = vld [vmem:[#allocation6 + $0x30] sm:$0xff]  ;;  %v152_v16 = vld [vmem:[#allocation6 + $0x38] sm:$0xff]  ;;  %v153_v20 = vld [vmem:[#allocation6 + $0x40] sm:$0xff]  ;;  %vm841_vm0 = vmmov 0   ;;  %v842_v33 = vmov 0.0   ;;  %s843_s22 = smov [#allocation11]  }
  0x4d   :  { %611 = vmatpush3.bf16.msra.mxu0 %v610_v6  ;;  %v619_v19 = vpack.c.bf16 %v152_v16, %v151_v15  ;;  %v154_v21 = vld [vmem:[#allocation6 + $0x48] sm:$0xff]  ;;  %v155_v25 = vld [vmem:[#allocation6 + $0x50] sm:$0xff]  ;;  %v156_v26 = vld [vmem:[#allocation6 + $0x58] sm:$0xff]  ;;  %536 = vmatprep.mubr.msk.f32.mxu0 %vm841_vm0, %v842_v33  ;;  %v84_v59 = vand.u32 127, %v83_v56  ;;  %s432_s23 = sshll.u32 %s843_s22, 4  ;;  %s433_s23 = int_to_ptr.vmem [resolvable:$true] %s432_s23 }
  0x4e   :  { %612 = vmatprep.subr.bf16.mxu0 %v834_v2  ;;  %v622_v24 = vpack.c.bf16 %v154_v21, %v153_v20  ;;  %v625_v27 = vpack.c.bf16 %v156_v26, %v155_v25  ;;  %v157_v28 = vld [vmem:[#allocation6 + $0x60] sm:$0xff]  ;;  %v158_v29 = vld [vmem:[#allocation6 + $0x68] sm:$0xff]  ;;  %v159_v31 = vld [vmem:[#allocation6 + $0x70] sm:$0xff]  ;;  %571 = vmatprep.mubr.msk.f32.mxu1 %vm841_vm0, %v842_v33  ;;  %s796_s24 = scalar_lea.vmem %s433_s23, 128  ;;  %p801_p5 = scmp.lt.s32.totalorder %s433_s23, %s433_s23 }
  0x4f   :  { %v628_v30 = vpack.c.bf16 %v158_v29, %v157_v28  ;;  %v160_v32 = vld [vmem:[#allocation6 + $0x78] sm:$0xff]  ;;  %v238_v34 = vld [vmem:[#allocation8] sm:$0xff]  ;;  %v239_v35 = vld [vmem:[#allocation8 + $0x8] sm:$0xff]  ;;  %p797_p4 = scmp.ne.s32.totalorder %s433_s23, %s796_s24  ;;  %p802_p6 = scmp.lt.s32.totalorder %s796_s24, %s796_s24 }
  0x50   :  { %702 = vset.pattern.permute.xlu1 %v835_v10  ;;  %700 = vset.pattern.permute.xlu0 %v836_v11  ;;  %v240_v36 = vld [vmem:[#allocation8 + $0x10] sm:$0xff]  ;;  %v634_v37 = vpack.c.bf16 %v239_v35, %v238_v34  ;;  %v241_v38 = vld [vmem:[#allocation8 + $0x18] sm:$0xff]  ;;  %v631_v39 = vpack.c.bf16 %v160_v32, %v159_v31  ;;  %v242_v41 = vld [vmem:[#allocation8 + $0x20] sm:$0xff] }
  0x51   :  { %110 = vperm.xlu1 %702, %v82_v3   ;;  %96 = vperm.xlu0 %700, %v82_v3   ;;  %v637_v40 = vpack.c.bf16 %v241_v38, %v240_v36  ;;  %v243_v42 = vld [vmem:[#allocation8 + $0x28] sm:$0xff]  ;;  %v244_v44 = vld [vmem:[#allocation8 + $0x30] sm:$0xff]  ;;  %v245_v45 = vld [vmem:[#allocation8 + $0x38] sm:$0xff]  ;;  %p803_p7 = por %p802_p6, %p801_p5 }
  0x52   :  { %614 = vmatpush3.bf16.msra.mxu0 %v613_v9  ;;  %635 = vmatpush3.bf16.msra.mxu1 %v634_v37  ;;  %v640_v43 = vpack.c.bf16 %v243_v42, %v242_v41  ;;  %v643_v46 = vpack.c.bf16 %v245_v45, %v244_v44  ;;  %v246_v47 = vld [vmem:[#allocation8 + $0x40] sm:$0xff]  ;;  %v247_v48 = vld [vmem:[#allocation8 + $0x48] sm:$0xff]  ;;  %v248_v50 = vld [vmem:[#allocation8 + $0x50] sm:$0xff] }
  0x53   :  { %615 = vmatprep.subr.bf16.mxu0 %v834_v2  ;;  %636 = vmatprep.subr.bf16.mxu1 %v834_v2  ;;  %v646_v49 = vpack.c.bf16 %v247_v48, %v246_v47  ;;  %v249_v51 = vld [vmem:[#allocation8 + $0x58] sm:$0xff]  ;;  %v250_v53 = vld [vmem:[#allocation8 + $0x60] sm:$0xff]  ;;  %v251_v54 = vld [vmem:[#allocation8 + $0x68] sm:$0xff]  ;;  %p804_p8 = pnand %p803_p7, %p797_p4 }
  0x54   :  { %v649_v52 = vpack.c.bf16 %v249_v51, %v248_v50  ;;  %v652_v55 = vpack.c.bf16 %v251_v54, %v250_v53  ;;  %v332_v21 = vld [vmem:[#allocation9] sm:$0xff]  ;;  %v335_v25 = vld [vmem:[#allocation9 + $0x18] sm:$0xff]  ;;  %v337_v28 = vld [vmem:[#allocation9 + $0x28] sm:$0xff] }
  0x55   :  { %703 = vset.pattern.permute.xlu1 %v837_v17  ;;  %704 = vset.pattern.permute.xlu0 %v838_v18  ;;  %v252_v18 = vld [vmem:[#allocation8 + $0x70] sm:$0xff]  ;;  %v339_v31 = vld [vmem:[#allocation9 + $0x38] sm:$0xff]  ;;  %v341_v34 = vld [vmem:[#allocation9 + $0x48] sm:$0xff] }
  0x56   :  { %117 = vperm.xlu1 %703, %v82_v3   ;;  %124 = vperm.xlu0 %704, %v82_v3   ;;  %v342_v36 = vld [vmem:[#allocation9 + $0x50] sm:$0xff]  ;;  %v343_v37 = vld [vmem:[#allocation9 + $0x58] sm:$0xff] }
  0x57   :  { %617 = vmatpush3.bf16.msra.mxu0 %v616_v14  ;;  %638 = vmatpush3.bf16.msra.mxu1 %v637_v40  ;;  %v673_v38 = vpack.c.bf16 %v343_v37, %v342_v36  ;;  %v345_v40 = vld [vmem:[#allocation9 + $0x68] sm:$0xff]  ;;  %v346_v45 = vld [vmem:[#allocation9 + $0x70] sm:$0xff]  ;;  %v451_v48 = vld [vmem:[%s995_s3] ss:$0 sm:$0xff] }
  0x58   :  { %618 = vmatprep.subr.bf16.mxu0 %v834_v2  ;;  %639 = vmatprep.subr.bf16.mxu1 %v834_v2 }
  0x5a   :  { %705 = vset.pattern.permute.xlu1 %v839_v22  ;;  %707 = vset.pattern.permute.xlu0 %v840_v23  ;;  %v333_v22 = vld [vmem:[#allocation9 + $0x8] sm:$0xff] }
  0x5b   :  { %131 = vperm.xlu1 %705, %v82_v3   ;;  %620 = vmatpush3.bf16.msra.mxu0 %v619_v19  ;;  %v253_v19 = vld [vmem:[#allocation8 + $0x78] sm:$0xff] }
  0x5c   :  { %621 = vmatprep.subr.bf16.mxu0 %v834_v2  ;;  %641 = vmatpush3.bf16.msra.mxu1 %v640_v43  ;;  %v655_v20 = vpack.c.bf16 %v253_v19, %v252_v18 }
  0x5d   :  { %642 = vmatprep.subr.bf16.mxu1 %v834_v2 }
  0x5f   :  { %706 = vset.pattern.permute.xlu1 %v840_v23  ;;  %623 = vmatpush3.bf16.msra.mxu0 %v622_v24  ;;  %v334_v23 = vld [vmem:[#allocation9 + $0x10] sm:$0xff]  ;;  %v658_v24 = vpack.c.bf16 %v333_v22, %v332_v21 }
  0x60   :  { %138 = vperm.xlu1 %706, %v82_v3   ;;  %624 = vmatprep.subr.bf16.mxu0 %v834_v2  ;;  %v661_v26 = vpack.c.bf16 %v335_v25, %v334_v23 }
  0x61   :  { %644 = vmatpush3.bf16.msra.mxu1 %v643_v46  ;;  %v347_v46 = vld [vmem:[#allocation9 + $0x78] sm:$0xff] }
  0x62   :  { %645 = vmatprep.subr.bf16.mxu1 %v834_v2  ;;  %v679_v47 = vpack.c.bf16 %v347_v46, %v346_v45 }
  0x63   :  { %626 = vmatpush3.bf16.msra.mxu0 %v625_v27  ;;  %v336_v27 = vld [vmem:[#allocation9 + $0x20] sm:$0xff] }
  0x64   :  { %627 = vmatprep.subr.bf16.mxu0 %v834_v2  ;;  %v664_v29 = vpack.c.bf16 %v337_v28, %v336_v27 }
  0x65   :  { %647 = vmatpush3.bf16.msra.mxu1 %v646_v49 }
  0x66   :  { %648 = vmatprep.subr.bf16.mxu1 %v834_v2 }
  0x67   :  { %629 = vmatpush3.bf16.msra.mxu0 %v628_v30  ;;  %v338_v30 = vld [vmem:[#allocation9 + $0x30] sm:$0xff] }
  0x68   :  { %630 = vmatprep.subr.bf16.mxu0 %v834_v2  ;;  %v667_v32 = vpack.c.bf16 %v339_v31, %v338_v30 }
  0x69   :  { %650 = vmatpush3.bf16.msra.mxu1 %v649_v52 }
  0x6a   :  { %651 = vmatprep.subr.bf16.mxu1 %v834_v2 }
  0x6b   :  { %632 = vmatpush3.bf16.msra.mxu0 %v631_v39  ;;  %v344_v39 = vld [vmem:[#allocation9 + $0x60] sm:$0xff] }
  0x6c   :  { %657 = vmatprep.subr.bf16.mxu0 %v834_v2  ;;  %v676_v41 = vpack.c.bf16 %v345_v40, %v344_v39 }
  0x6d   :  { %653 = vmatpush3.bf16.msra.mxu1 %v652_v55 }
  0x6e   :  { %654 = vmatprep.subr.bf16.mxu1 %v834_v2 }
  0x71   :  { %656 = vmatpush3.bf16.msra.mxu1 %v655_v20 }
  0xcb   :  { %v104_v57 = vpop.permute.xlu1 %103  ;;  %v90_v58 = vpop.permute.xlu0 %89 }
  0xcc   :  { %vm91_vm1 = vcmp.eq.s32.totalorder %v84_v59, %v90_v58  ;;  %vm105_vm2 = vcmp.eq.s32.totalorder %v84_v59, %v104_v57 }
  0xcd   :  { %v443_v62 = vsel %vm91_vm1, 1.0, %v842_v33  ;;  %v445_v1 = vsel %vm105_vm2, 1.0, %v842_v33 }
  0xd0   :  { %v111_v60 = vpop.permute.xlu1 %110  ;;  %v97_v61 = vpop.permute.xlu0 %96 }
  0xd1   :  { %vm98_vm3 = vcmp.eq.s32.totalorder %v84_v59, %v97_v61  ;;  %vm112_vm4 = vcmp.eq.s32.totalorder %v84_v59, %v111_v60 }
  0xd2   :  { %v444_v63 = vsel %vm98_vm3, 1.0, %v842_v33  ;;  %v446_v6 = vsel %vm112_vm4, 1.0, %v842_v33 }
  0xd3   :  { %v101_v0 = vadd.f32 %v444_v63, %v443_v62 }
  0xd5   :  { %v108_v3 = vadd.f32 %v445_v1, %v101_v0  ;;  %v118_v4 = vpop.permute.xlu1 %117  ;;  %v125_v5 = vpop.permute.xlu0 %124 }
  0xd6   :  { %vm119_vm5 = vcmp.eq.s32.totalorder %v84_v59, %v118_v4  ;;  %vm126_vm6 = vcmp.eq.s32.totalorder %v84_v59, %v125_v5 }
  0xd7   :  { %v115_v7 = vadd.f32 %v446_v6, %v108_v3  ;;  %v447_v8 = vsel %vm119_vm5, 1.0, %v842_v33  ;;  %v448_v10 = vsel %vm126_vm6, 1.0, %v842_v33 }
  0xd9   :  { %v122_v9 = vadd.f32 %v447_v8, %v115_v7 }
  0xda   :  { %v132_v11 = vpop.permute.xlu1 %131 }
  0xdb   :  { %vm133_vm7 = vcmp.eq.s32.totalorder %v84_v59, %v132_v11  ;;  %v129_v12 = vadd.f32 %v448_v10, %v122_v9 }
  0xdc   :  { %v449_v13 = vsel %vm133_vm7, 1.0, %v842_v33 }
  0xdd   :  { %v136_v15 = vadd.f32 %v449_v13, %v129_v12 }
  0xdf   :  { %v139_v14 = vpop.permute.xlu1 %138 }
  0xe0   :  { %vm140_vm8 = vcmp.eq.s32.totalorder %v84_v59, %v139_v14 }
  0xe1   :  { %v450_v16 = vsel %vm140_vm8, 1.0, %v842_v33 }
  0xe2   :  { %v143_v17 = vadd.f32 %v450_v16, %v136_v15 }
  0xe4   :  { %537 = vmatmul.mubr.f32.vlgmr.msra.gmra.mrb[0].mxu0 %v143_v17 }
  0xe5   :  { %606 = vmatprep.mubr.msk.f32.mxu0 %vm841_vm0, %v842_v33  ;;  %659 = vmatpush3.bf16.msra.mxu0 %v658_v24  ;;  %v340_v33 = vld [vmem:[#allocation9 + $0x40] sm:$0xff] }
  0xe6   :  { %660 = vmatprep.subr.bf16.mxu0 %v834_v2  ;;  %v670_v35 = vpack.c.bf16 %v341_v34, %v340_v33 }
  0xe9   :  { %662 = vmatpush3.bf16.msra.mxu0 %v661_v26 }
  0xea   :  { %663 = vmatprep.subr.bf16.mxu0 %v834_v2 }
  0xed   :  { %665 = vmatpush3.bf16.msra.mxu0 %v664_v29 }
  0xee   :  { %666 = vmatprep.subr.bf16.mxu0 %v834_v2 }
  0xf1   :  { %668 = vmatpush3.bf16.msra.mxu0 %v667_v32 }
  0xf2   :  { %669 = vmatprep.subr.bf16.mxu0 %v834_v2 }
  0xf5   :  { %671 = vmatpush3.bf16.msra.mxu0 %v670_v35 }
  0xf6   :  { %672 = vmatprep.subr.bf16.mxu0 %v834_v2 }
  0xf9   :  { %674 = vmatpush3.bf16.msra.mxu0 %v673_v38 }
  0xfa   :  { %675 = vmatprep.subr.bf16.mxu0 %v834_v2 }
  0xfd   :  { %677 = vmatpush3.bf16.msra.mxu0 %v676_v41 }
  0xfe   :  { %678 = vmatprep.subr.bf16.mxu0 %v834_v2  ;;  %v452_v2 = vld [vmem:[%s997_s5] ss:$0 sm:$0xff] }
 0x101   :  { %680 = vmatpush3.bf16.msra.mxu0 %v679_v47 }
 0x1b7   :  { %v227_v42 = vpop.f32.mrb[0].mxu0 }
 0x1b8   :  { %v237_v43 = vmul.f32 0.125, %v227_v42  ;;  %v538_v44 = vpop.f32.mrb[1].mxu0 }
 0x1ba   :  { %572 = vmatmul.mubr.f32.vlgmr.msra.gmra.mrb[0].mxu1 %v237_v43 }
 0x28d   :  { %v327_v49 = vpop.f32.mrb[0].mxu1 }
 0x28e   :  { %v328_v50 = vadd.f32 %v451_v48, %v327_v49  ;;  %v573_v51 = vpop.f32.mrb[1].mxu1 }
 0x290   :  { %v331_v52 = vmax.f32 %v328_v50, 0.0 }
 0x292   :  { %607 = vmatmul.mubr.f32.vlgmr.msra.gmra.mrb[2].mxu0 %v331_v52 }
 0x365   :  { %v421_v53 = vpop.f32.mrb[2].mxu0 }
 0x366   :  { %v422_v54 = vadd.f32 %v452_v2, %v421_v53  ;;  %v608_v55 = vpop.f32.mrb[3].mxu0 }
 0x368   :  { %425 = vst [vmem:[#allocation11] sm:$0xff] %v422_v54 }
 0x369   :  { %807 = shalt.err (!%p804_p8)
}
 0x36a   :  { %s808_s26 = scalar_lea.hbm %s998_s6, 128 }
 0x36b   :  { %p809_p9 = scmp.ne.s32.totalorder %s998_s6, %s808_s26  ;;  %p812_p10 = scmp.lt.u32.totalorder %s808_s26, %s998_s6 }
 0x36d   :  { %p814_p11 = pnand %p812_p10, %p809_p9 }
 0x36f   :  { %817 = shalt.err (!%p814_p11)
}
 0x370   :  { %435 = dma.vmem_to_hbm [thread:$0]  %s433_s23, 128, %s998_s6, [#allocation5]  }
 0x371   :  { %824 = dma.done.wait [#allocation5], 128  }
 0x372   :  { %825 = vsyncadd [#allocation5], 4294967168 }
 0x373   :  { %439 = vsyncpa [#allocation4], 1 }
 0x374   :  { %440 = vsyncpa [#allocation7], 1 }
 0x375   :  { %441 = vsyncpa [#allocation10], 1 }
 0x376   :  { %442 = vsyncpa [#allocation5], 1 }

</bundles_post_ra>
